<compile_context>
chip_gen: v7x
topology: tpu7x:2x2x1
jax: 0.10.0
libtpu: 0.0.40
codegen_flags: <defaults>
</compile_context>

<pallas_src>
import functools

import jax
import jax.numpy as jnp
from jax.experimental import pallas as pl
from jax.experimental.pallas import tpu as pltpu


def _parametric_abs_kernel(x_ref, o_ref, *, alpha, beta, gamma):
    # Python-float scalars are weak-typed: math stays in x's dtype (bf16/f32).
    x = x_ref[...]
    o_ref[...] = (alpha * jnp.abs(x + beta) + gamma).astype(o_ref.dtype)


def _tpu_generation():
    """Return (is_v7x, num_tensorcores_per_chip). Conservative fallback."""
    try:
        kind = (getattr(jax.devices()[0], "device_kind", "") or "").lower()
    except Exception:
        kind = ""
    is_v7 = "v7" in kind
    num_cores = 2 if is_v7 else 1
    return is_v7, num_cores


def parametric_abs(x: jax.Array, alpha: float, beta: float, gamma: float) -> jax.Array:
    """Apply f(x) = alpha*|x + beta| + gamma elementwise via a Pallas TPU kernel."""
    orig_shape = x.shape
    if not jnp.issubdtype(x.dtype, jnp.floating):
        # Match PyTorch promotion (float buffers * int tensor -> float result).
        x = x.astype(jnp.float32)
    dtype = x.dtype
    n = x.size
    itemsize = jnp.dtype(dtype).itemsize
    min_rows = max(8, 32 // itemsize)  # sublane minimum: 8 f32, 16 bf16, 32 int8/fp8

    alpha = float(alpha)
    beta = float(beta)
    gamma = float(gamma)

    x_flat = x.reshape(-1)

    # Lane width: prefer the widest that tiles n exactly (no tail at all).
    lanes = None
    for cand in (1024, 512, 256, 128):
        if n % cand == 0 and (n // cand) % min_rows == 0:
            lanes = cand
            break
    if lanes is None:
        lanes = 128  # ragged input: largest (min_rows*128)-aligned prefix in-kernel

    chunk = min_rows * lanes
    main_rows = (n // chunk) * min_rows
    main_n = main_rows * lanes

    if main_rows == 0:
        # Tiny array (< one minimal tile): not worth a kernel launch.
        return (alpha * jnp.abs(x_flat + beta) + gamma).astype(dtype).reshape(orig_shape)

    is_v7, n_cores = _tpu_generation()

    # Block sizing: ~8 MiB on v7x (fast HBM, 2 TCs), ~2 MiB on v5e/v6e
    # (16/32 MiB scoped-VMEM defaults; in+out double-buffered = 4x block).
    target_bytes = (8 << 20) if is_v7 else (2 << 20)
    target_rows = max(min_rows,
                      (target_bytes // (lanes * itemsize)) // min_rows * min_rows)
    block_rows = min(target_rows, main_rows)
    if n_cores >= 2 and main_rows >= 2 * min_rows:
        # Guarantee at least one block per TensorCore on multi-TC chips (v7x).
        block_rows = min(block_rows,
                         pl.cdiv(pl.cdiv(main_rows, 2), min_rows) * min_rows)
    grid = (pl.cdiv(main_rows, block_rows),)

    if n_cores >= 2:
        sem = (getattr(pltpu, "CORE_PARALLEL", "parallel"),)
    else:
        sem = ("arbitrary",)  # single TC: grid is a serial loop, semantics moot
    cp_kwargs = dict(dimension_semantics=sem)
    if is_v7:
        cp_kwargs["vmem_limit_bytes"] = 48 << 20  # headroom for 8 MiB blocks
    compiler_params = pltpu.CompilerParams(**cp_kwargs)

    kernel = functools.partial(
        _parametric_abs_kernel, alpha=alpha, beta=beta, gamma=gamma)

    x2d = x_flat[:main_n].reshape(main_rows, lanes)
    out2d = pl.pallas_call(
        kernel,
        out_shape=jax.ShapeDtypeStruct((main_rows, lanes), dtype),
        grid=grid,
        in_specs=[pl.BlockSpec((block_rows, lanes), lambda i: (i, 0))],
        out_specs=pl.BlockSpec((block_rows, lanes), lambda i: (i, 0)),
        compiler_params=compiler_params,
    )(x2d)

    out_flat = out2d.reshape(-1)
    if main_n != n:
        # Ragged tail (< min_rows*128 elements): plain JAX, no whole-array pad/slice.
        tail = x_flat[main_n:]
        tail_out = (alpha * jnp.abs(tail + beta) + gamma).astype(dtype)
        out_flat = jnp.concatenate([out_flat, tail_out])
    return out_flat.reshape(orig_shape)


if __name__ == "__main__":
    # Non-learnable buffers in the PyTorch module; perturbed from defaults so
    # all three terms are exercised.
    alpha, beta, gamma = 1.5, -0.25, 0.1

    key = jax.random.PRNGKey(0)
    x = jax.random.normal(key, (2, 4, 16, 16), dtype=jnp.float32)  # NCHW

    out = parametric_abs(x, alpha, beta, gamma)
    out = jax.block_until_ready(out)

    # Reference check in plain JAX.
    ref = alpha * jnp.abs(x + beta) + gamma
    assert out.shape == x.shape and out.dtype == x.dtype
    assert jnp.allclose(out, ref, atol=1e-6, rtol=1e-6)

    print("KERNEL_OK")
</pallas_src>

<mosaic_0001>
module attributes {stable_mosaic.version = 11 : i64} {
  func.func @_parametric_abs_kernel(%arg0: i32, %arg1: memref<8x256xf32, #tpu.memory_space<vmem>>, %arg2: memref<8x256xf32, #tpu.memory_space<vmem>>) attributes {dimension_semantics = [#tpu.dimension_semantics<arbitrary>], iteration_bounds = array<i64: 1>, scalar_prefetch = 0 : i64, scratch_operands = 0 : i64, tpu.core_type = #tpu.core_type<tc>, window_params = [{transform_indices = @transform_0, window_bounds = array<i64: 8, 256>}, {transform_indices = @transform_1, window_bounds = array<i64: 8, 256>}]} {
    %c0 = arith.constant 0 : index
    %c0_0 = arith.constant 0 : index
    %0 = vector.load %arg1[%c0, %c0_0] : memref<8x256xf32, #tpu.memory_space<vmem>>, vector<8x256xf32>
    %cst = arith.constant -2.500000e-01 : f32
    %1 = vector.broadcast %cst : f32 to vector<8x256xf32>
    %2 = arith.addf %0, %1 : vector<8x256xf32>
    %3 = math.absf %2 : vector<8x256xf32>
    %cst_1 = arith.constant 1.500000e+00 : f32
    %4 = vector.broadcast %cst_1 : f32 to vector<8x256xf32>
    %5 = arith.mulf %4, %3 : vector<8x256xf32>
    %cst_2 = arith.constant 1.000000e-01 : f32
    %6 = vector.broadcast %cst_2 : f32 to vector<8x256xf32>
    %7 = arith.addf %5, %6 : vector<8x256xf32>
    %c0_3 = arith.constant 0 : index
    %c0_4 = arith.constant 0 : index
    %8 = vector.load %arg2[%c0_3, %c0_4] : memref<8x256xf32, #tpu.memory_space<vmem>>, vector<8x256xf32>
    tpu.vector_store %arg2[%c0_3, %c0_4], %7 {strides = array<i32>} : memref<8x256xf32, #tpu.memory_space<vmem>>, vector<8x256xf32>,
    return
  }
  func.func @transform_0(%arg0: i32) -> (i32, i32) {
    %c0_i32 = arith.constant 0 : i32
    %c0_i32_0 = arith.constant 0 : i32
    return %arg0, %c0_i32 : i32, i32
  }
  func.func @transform_1(%arg0: i32) -> (i32, i32) {
    %c0_i32 = arith.constant 0 : i32
    %c0_i32_0 = arith.constant 0 : i32
    return %arg0, %c0_i32 : i32, i32
  }
}

</mosaic_0001>

<bundles_post_ra>
// kernel: tpu_custom_call.1
= control target key start
LH: loop header
LB: loop body
LE: loop exit
PB: predicated region body
PF: predicated region fallthrough
CT: control target
= control target key end

     0   :  { %6 = vsyncpa [#allocation3], 0  ;;  %s134_s0 = inlined_call_operand.hbm [shape: f32[8,256], index: 0, kind: input, shape index: {}]   ;;  %s135_s1 = inlined_call_operand.hbm [shape: f32[8,256], index: 1, kind: output, shape index: {}]  }
   0x1   :  { %7 = vsyncpa [#allocation4], 0  ;;  %s98_s6 = smov [#allocation2]   ;;  %s50_s10 = scalar_lea.hbm %s134_s0, 256 }
   0x2   :  { %s14_s7 = sshll.u32 %s98_s6, 4  ;;  %p51_p0 = scmp.ne.s32.totalorder %s134_s0, %s50_s10  ;;  %s15_s7 = int_to_ptr.vmem [resolvable:$true] %s14_s7 }
   0x3   :  { %p54_p1 = scmp.lt.u32.totalorder %s50_s10, %s134_s0 }
   0x5   :  { %p56_p2 = pnand %p54_p1, %p51_p0 }
   0x7   :  { %59 = shalt.err (!%p56_p2)
}
   0x8   :  { %s60_s15 = scalar_lea.vmem %s15_s7, 256  ;;  %p65_p4 = scmp.lt.s32.totalorder %s15_s7, %s15_s7 }
   0x9   :  { %p61_p3 = scmp.ne.s32.totalorder %s15_s7, %s60_s15  ;;  %p66_p5 = scmp.lt.s32.totalorder %s60_s15, %s60_s15 }
   0xb   :  { %p67_p6 = por %p66_p5, %p65_p4 }
   0xd   :  { %p68_p7 = pnand %p67_p6, %p61_p3 }
   0xf   :  { %71 = shalt.err (!%p68_p7)
}
  0x10   :  { %17 = dma.hbm_to_vmem [thread:$0]  %s134_s0, 256, %s15_s7, [#allocation3]  }
  0x11   :  { %94 = dma.done.wait [#allocation3], 256  }
  0x12   :  { %95 = vsyncadd [#allocation3], 4294967040  ;;  %v21_v0 = vld [vmem:[#allocation2] sm:$0xff]  ;;  %v22_v1 = vld [vmem:[#allocation2 + $0x8] sm:$0xff]  ;;  %s99_s18 = smov [#allocation5]  }
  0x13   :  { %v23_v2 = vadd.f32 -0.25, %v21_v0  ;;  %v24_v3 = vadd.f32 -0.25, %v22_v1  ;;  %s39_s19 = sshll.u32 %s99_s18, 4  ;;  %s40_s19 = int_to_ptr.vmem [resolvable:$true] %s39_s19 }
  0x14   :  { %s72_s20 = scalar_lea.vmem %s40_s19, 256  ;;  %p77_p9 = scmp.lt.s32.totalorder %s40_s19, %s40_s19 }
  0x15   :  { %v25_v4 = vand.u32 2147483647, %v23_v2  ;;  %v26_v5 = vand.u32 2147483647, %v24_v3  ;;  %p73_p8 = scmp.ne.s32.totalorder %s40_s19, %s72_s20  ;;  %p78_p10 = scmp.lt.s32.totalorder %s72_s20, %s72_s20 }
  0x17   :  { %v27_v6 = vmul.f32 1.5, %v25_v4  ;;  %v28_v7 = vmul.f32 1.5, %v26_v5  ;;  %p79_p11 = por %p78_p10, %p77_p9 }
  0x19   :  { %v29_v8 = vadd.f32 0.1, %v27_v6  ;;  %v30_v9 = vadd.f32 0.1, %v28_v7  ;;  %p80_p12 = pnand %p79_p11, %p73_p8 }
  0x1b   :  { %31 = vst [vmem:[#allocation5] sm:$0xff] %v29_v8  ;;  %32 = vst [vmem:[#allocation5 + $0x8] sm:$0xff] %v30_v9 }
  0x1c   :  { %83 = shalt.err (!%p80_p12)
}
  0x1d   :  { %s84_s22 = scalar_lea.hbm %s135_s1, 256 }
  0x1e   :  { %p85_p13 = scmp.ne.s32.totalorder %s135_s1, %s84_s22  ;;  %p88_p0 = scmp.lt.u32.totalorder %s84_s22, %s135_s1 }
  0x20   :  { %p90_p1 = pnand %p88_p0, %p85_p13 }
  0x22   :  { %93 = shalt.err (!%p90_p1)
}
  0x23   :  { %42 = dma.vmem_to_hbm [thread:$0]  %s40_s19, 256, %s135_s1, [#allocation4]  }
  0x24   :  { %96 = dma.done.wait [#allocation4], 256  }
  0x25   :  { %97 = vsyncadd [#allocation4], 4294967040 }
  0x26   :  { %46 = vsyncpa [#allocation3], 1 }
  0x27   :  { %47 = vsyncpa [#allocation4], 1 }

</bundles_post_ra>
